<compile_context>
chip_gen: v7x
topology: tpu7x:2x2x1
jax: 0.10.0
libtpu: 0.0.40
codegen_flags: <defaults>
</compile_context>

<pallas_src>
import functools

import jax
import jax.numpy as jnp
from jax.experimental import pallas as pl
from jax.experimental.pallas import tpu as pltpu


def _round_up(a, m):
    return (a + m - 1) // m * m


def _tpu_vmem_budget_bytes():
    """Generation-aware usable VMEM budget (headroom below the physical cap)."""
    cap = 64 << 20  # conservative fallback (v7x per-TC VMEM)
    try:
        cap = int(pltpu.get_tpu_info().vmem_capacity_bytes)
    except Exception:
        pass
    # ~48 MiB on v7x (64 MiB cap), ~100 MiB on v5e/v6e (128 MiB cap).
    return int(min(max(cap - (16 << 20), 32 << 20), 100 << 20))


def _use_bf16_gelu():
    """bf16 VPU/EUP exists on v6e/v7x; keep f32 elementwise math on older chips."""
    try:
        kind = jax.devices()[0].device_kind.lower()
    except Exception:
        kind = ""
    return ("v6" in kind) or ("v7" in kind)


def _rev_seq_kernel(resident, use_bf16_gelu,
                    x_ref,
                    wf1_ref, bf1_ref, wf2_ref, bf2_ref,
                    wg1_ref, bg1_ref, wg2_ref, bg2_ref,
                    out_ref,
                    x1_s, x2_s):
    d = pl.program_id(1)
    nd = pl.num_programs(1)

    @pl.when(d == 0)
    def _():
        # torch.cat([x, x], dim=-1) then chunk -> x1 = x2 = x  (per token tile)
        xin = x_ref[...].astype(jnp.float32)
        x1_s[...] = xin
        x2_s[...] = xin

    x1 = x1_s[...]
    x2 = x2_s[...]

    if resident:
        # Whole weight stack is VMEM-resident for the entire grid; pick depth slice.
        wf1, bf1, wf2, bf2 = wf1_ref[d], bf1_ref[d], wf2_ref[d], bf2_ref[d]
        wg1, bg1, wg2, bg2 = wg1_ref[d], bg1_ref[d], wg2_ref[d], bg2_ref[d]
    else:
        # Per-depth streamed slabs (double-buffered by the Pallas pipeline).
        wf1, bf1, wf2, bf2 = wf1_ref[...], bf1_ref[...], wf2_ref[...], bf2_ref[...]
        wg1, bg1, wg2, bg2 = wg1_ref[...], bg1_ref[...], wg2_ref[...], bg2_ref[...]

    def mlp(z, w1, b1, w2, b2):
        h = jnp.dot(z.astype(jnp.bfloat16), w1,
                    preferred_element_type=jnp.float32) + b1
        if use_bf16_gelu:
            h = jax.nn.gelu(h.astype(jnp.bfloat16))   # packed bf16 VPU/EUP (v6e/v7x)
        else:
            h = jax.nn.gelu(h).astype(jnp.bfloat16)   # f32 elementwise (v5e-safe)
        return jnp.dot(h, w2, preferred_element_type=jnp.float32) + b2

    y1 = x1 + mlp(x2, wf1, bf1, wf2, bf2)   # y1 = x1 + f(x2)
    y2 = x2 + mlp(y1, wg1, bg1, wg2, bg2)   # y2 = x2 + g(y1)

    # Carry to the next depth step; skip the stores on the last step.
    @pl.when(d < nd - 1)
    def _():
        x1_s[...] = y1
        x2_s[...] = y2

    @pl.when(d == nd - 1)
    def _():
        # stack(chunk(out, 2, dim=-1)).mean(0)  ==  0.5 * (y1 + y2)
        out_ref[...] = (0.5 * (y1 + y2)).astype(out_ref.dtype)


@functools.partial(jax.jit, static_argnames=("block_tokens",))
def reversible_sequence_forward(x, params, *, block_tokens=1024):
    """x: (B, N, D).  params: dict of stacked per-depth weights.

    Returns (out, aux_loss) matching ReversibleSequence.forward (eval mode).
    """
    B, N, D = x.shape
    T = B * N
    depth, _, H = params["wf1"].shape

    D_pad = _round_up(D, 128)
    H_pad = _round_up(H, 128)
    out_dtype = x.dtype
    out_isz = jnp.dtype(out_dtype).itemsize

    budget = _tpu_vmem_budget_bytes()
    use_bf16_gelu = _use_bf16_gelu()

    # Weight footprints (bf16 weights + f32 biases), per depth step and total.
    w_step_bytes = 4 * D_pad * H_pad * 2 + 2 * (H_pad + D_pad) * 4
    w_all_bytes = depth * w_step_bytes

    def act_bytes(tm):
        return (2 * tm * D_pad * 4            # x block, double-buffered (f32)
                + 2 * tm * D_pad * out_isz    # out block, double-buffered
                + 2 * tm * D_pad * 4          # x1/x2 f32 carries (kept f32 on purpose)
                + 2 * tm * H_pad * 4)         # elementwise intermediates headroom

    def fits(tm, resident):
        w = 2 * w_all_bytes if resident else 2 * w_step_bytes  # conservative 2x
        return act_bytes(tm) + w + (4 << 20) <= budget

    # Keep the whole bf16 weight stack VMEM-resident when it fits: weights are then
    # DMA'd once per call instead of once per (token tile, depth step).
    resident = fits(8, True)

    # Token tile: as large as VMEM allows (amortizes weight streaming when not
    # resident), but always >= 2 tiles so both v7x TensorCores get work.
    tm = max(8, min(block_tokens, _round_up(max((T + 1) // 2, 8), 8)))
    while tm > 8 and not fits(tm, resident):
        tm = _round_up(tm // 2, 8)
    # TODO(synk): for very large D/H where even one per-depth weight slab cannot be
    # double-buffered at tm=8, add an inner hidden-dim tile loop (H-tiling on v7x).

    T_pad = _round_up(T, tm)
    n_tiles = T_pad // tm

    # ---- pad activations only when needed (skip the extra HBM pass otherwise) ----
    x2d = x.reshape(T, D).astype(jnp.float32)
    if T_pad == T and D_pad == D:
        x_p = x2d
    else:
        x_p = jnp.zeros((T_pad, D_pad), jnp.float32).at[:T, :D].set(x2d)

    def pad_w(w):
        r, c = w.shape[1], w.shape[2]
        rp, cp = _round_up(r, 128), _round_up(c, 128)
        if (rp, cp) == (r, c):
            return w.astype(jnp.bfloat16)
        return (jnp.zeros((depth, rp, cp), jnp.float32)
                .at[:, :r, :c].set(w).astype(jnp.bfloat16))

    def pad_b(b):
        c = b.shape[1]
        cp = _round_up(c, 128)
        if cp == c:
            return b.reshape(depth, 1, c).astype(jnp.float32)
        return jnp.zeros((depth, 1, cp), jnp.float32).at[:, 0, :c].set(b)

    wf1, bf1 = pad_w(params["wf1"]), pad_b(params["bf1"])
    wf2, bf2 = pad_w(params["wf2"]), pad_b(params["bf2"])
    wg1, bg1 = pad_w(params["wg1"]), pad_b(params["bg1"])
    wg2, bg2 = pad_w(params["wg2"]), pad_b(params["bg2"])

    # BlockSpecs: token tile indexed by t; weights either fully resident (constant
    # index map -> single DMA for the whole grid) or streamed per depth step.
    x_spec = pl.BlockSpec((tm, D_pad), lambda t, d: (t, 0))
    out_spec = pl.BlockSpec((tm, D_pad), lambda t, d: (t, 0))
    if resident:
        w_dh = pl.BlockSpec((depth, D_pad, H_pad), lambda t, d: (0, 0, 0))
        w_hd = pl.BlockSpec((depth, H_pad, D_pad), lambda t, d: (0, 0, 0))
        b_h = pl.BlockSpec((depth, 1, H_pad), lambda t, d: (0, 0, 0))
        b_d = pl.BlockSpec((depth, 1, D_pad), lambda t, d: (0, 0, 0))
    else:
        w_dh = pl.BlockSpec((None, D_pad, H_pad), lambda t, d: (d, 0, 0))
        w_hd = pl.BlockSpec((None, H_pad, D_pad), lambda t, d: (d, 0, 0))
        b_h = pl.BlockSpec((None, 1, H_pad), lambda t, d: (d, 0, 0))
        b_d = pl.BlockSpec((None, 1, D_pad), lambda t, d: (d, 0, 0))

    # Single-counted VMEM estimate (buffering already accounted inside fits/act_bytes).
    vmem_est = act_bytes(tm) + (2 * w_all_bytes if resident else 2 * w_step_bytes)
    vmem_limit = int(min(max(vmem_est + (8 << 20), 32 << 20), budget))

    flops = 2 * 4 * depth * T_pad * D_pad * H_pad            # 4 matmuls / block
    transcendentals = 2 * depth * T_pad * H_pad               # one tanh per hidden elem
    w_hbm = w_all_bytes if resident else w_all_bytes * n_tiles
    bytes_accessed = int(x_p.size * 4 + T_pad * D_pad * out_isz + w_hbm)

    kernel = functools.partial(_rev_seq_kernel, resident, use_bf16_gelu)

    out_p = pl.pallas_call(
        kernel,
        out_shape=jax.ShapeDtypeStruct((T_pad, D_pad), out_dtype),
        grid_spec=pltpu.PrefetchScalarGridSpec(
            num_scalar_prefetch=0,
            grid=(n_tiles, depth),
            in_specs=[
                x_spec,
                w_dh, b_h, w_hd, b_d,   # f weights
                w_dh, b_h, w_hd, b_d,   # g weights
            ],
            out_specs=out_spec,
            scratch_shapes=[
                pltpu.VMEM((tm, D_pad), jnp.float32),  # x1 carry
                pltpu.VMEM((tm, D_pad), jnp.float32),  # x2 carry
            ],
        ),
        compiler_params=pltpu.CompilerParams(
            dimension_semantics=("parallel", "arbitrary"),
            vmem_limit_bytes=vmem_limit),
        cost_estimate=pl.CostEstimate(
            flops=flops,
            transcendentals=transcendentals,
            bytes_accessed=bytes_accessed),
    )(x_p,
      wf1, bf1, wf2, bf2,
      wg1, bg1, wg2, bg2)

    out = out_p
    if T_pad != T or D_pad != D:
        out = out[:T, :D]
    out = out.reshape(B, N, D)
    # f/g return plain tensors -> cast_return supplies zero losses; their sum is 0.
    aux_loss = jnp.zeros((), dtype=x.dtype)
    return out, aux_loss


def _reference_forward(x, params, use_bf16_gelu):
    """Pure-JAX reference with the same bf16-operand / f32-accumulation math."""
    B, N, D = x.shape
    h = x.reshape(B * N, D).astype(jnp.float32)
    x1, x2 = h, h
    depth = params["wf1"].shape[0]

    def mlp(z, w1, b1, w2, b2):
        hh = jnp.dot(z.astype(jnp.bfloat16), w1.astype(jnp.bfloat16),
                     preferred_element_type=jnp.float32) + b1
        if use_bf16_gelu:
            hh = jax.nn.gelu(hh.astype(jnp.bfloat16))
        else:
            hh = jax.nn.gelu(hh).astype(jnp.bfloat16)
        return jnp.dot(hh, w2.astype(jnp.bfloat16),
                       preferred_element_type=jnp.float32) + b2

    for d in range(depth):
        y1 = x1 + mlp(x2, params["wf1"][d], params["bf1"][d],
                      params["wf2"][d], params["bf2"][d])
        y2 = x2 + mlp(y1, params["wg1"][d], params["bg1"][d],
                      params["wg2"][d], params["bg2"][d])
        x1, x2 = y1, y2
    out = (0.5 * (x1 + x2)).reshape(B, N, D).astype(x.dtype)
    return out, jnp.zeros((), x.dtype)


def _init_params(key, depth, D, H):
    ks = jax.random.split(key, 8)
    s_in = 1.0 / jnp.sqrt(D)
    s_h = 1.0 / jnp.sqrt(H)
    return {
        "wf1": jax.random.normal(ks[0], (depth, D, H), jnp.float32) * s_in,
        "bf1": jax.random.normal(ks[1], (depth, H), jnp.float32) * 0.01,
        "wf2": jax.random.normal(ks[2], (depth, H, D), jnp.float32) * s_h,
        "bf2": jax.random.normal(ks[3], (depth, D), jnp.float32) * 0.01,
        "wg1": jax.random.normal(ks[4], (depth, D, H), jnp.float32) * s_in,
        "bg1": jax.random.normal(ks[5], (depth, H), jnp.float32) * 0.01,
        "wg2": jax.random.normal(ks[6], (depth, H, D), jnp.float32) * s_h,
        "bg2": jax.random.normal(ks[7], (depth, D), jnp.float32) * 0.01,
    }


if __name__ == "__main__":
    B, N, D, H = 2, 8, 32, 64
    depth = 2

    key = jax.random.PRNGKey(0)
    k_x, k_p = jax.random.split(key)
    x = jax.random.normal(k_x, (B, N, D), jnp.float32)
    params = _init_params(k_p, depth, D, H)

    out, aux_loss = reversible_sequence_forward(x, params)
    out = jax.block_until_ready(out)
    aux_loss = jax.block_until_ready(aux_loss)

    ref_out, ref_loss = _reference_forward(x, params, _use_bf16_gelu())
    assert out.shape == (B, N, D)
    assert jnp.allclose(out, ref_out, atol=2e-2, rtol=2e-2), (
        float(jnp.max(jnp.abs(out - ref_out))))
    assert jnp.allclose(aux_loss, ref_loss)

    # NOTE: jax.nn.gelu defaults to the tanh approximation (EUP-friendly); PyTorch's
    # default nn.GELU uses exact erf, so numerics differ at the ~1e-3 level.
    # TODO(synk): layer_dropout / routed per-block kwargs (args_route) and the custom
    # reversible backward_pass are training-time features, not part of this forward.
    print("KERNEL_OK")
</pallas_src>

<mosaic_0001>
module attributes {stable_mosaic.version = 11 : i64} {
  func.func @_rev_seq_kernel(%arg0: i32, %arg1: i32, %arg2: memref<8x128xf32, #tpu.memory_space<vmem>>, %arg3: memref<2x128x128xbf16, #tpu.memory_space<vmem>>, %arg4: memref<2x1x128xf32, #tpu.memory_space<vmem>>, %arg5: memref<2x128x128xbf16, #tpu.memory_space<vmem>>, %arg6: memref<2x1x128xf32, #tpu.memory_space<vmem>>, %arg7: memref<2x128x128xbf16, #tpu.memory_space<vmem>>, %arg8: memref<2x1x128xf32, #tpu.memory_space<vmem>>, %arg9: memref<2x128x128xbf16, #tpu.memory_space<vmem>>, %arg10: memref<2x1x128xf32, #tpu.memory_space<vmem>>, %arg11: memref<8x128xf32, #tpu.memory_space<vmem>>, %arg12: memref<8x128xf32, #tpu.memory_space<vmem>>, %arg13: memref<8x128xf32, #tpu.memory_space<vmem>>) attributes {dimension_semantics = [#tpu.dimension_semantics<parallel>, #tpu.dimension_semantics<arbitrary>], iteration_bounds = array<i64: 2, 2>, scalar_prefetch = 0 : i64, scratch_operands = 2 : i64, tpu.core_type = #tpu.core_type<tc>, window_params = [{transform_indices = @transform_0, window_bounds = array<i64: 8, 128>}, {pipeline_mode = #tpu.pipeline_mode<synchronous>, transform_indices = @transform_1, window_bounds = array<i64: 2, 128, 128>}, {pipeline_mode = #tpu.pipeline_mode<synchronous>, transform_indices = @transform_2, window_bounds = array<i64: 2, 1, 128>}, {pipeline_mode = #tpu.pipeline_mode<synchronous>, transform_indices = @transform_3, window_bounds = array<i64: 2, 128, 128>}, {pipeline_mode = #tpu.pipeline_mode<synchronous>, transform_indices = @transform_4, window_bounds = array<i64: 2, 1, 128>}, {pipeline_mode = #tpu.pipeline_mode<synchronous>, transform_indices = @transform_5, window_bounds = array<i64: 2, 128, 128>}, {pipeline_mode = #tpu.pipeline_mode<synchronous>, transform_indices = @transform_6, window_bounds = array<i64: 2, 1, 128>}, {pipeline_mode = #tpu.pipeline_mode<synchronous>, transform_indices = @transform_7, window_bounds = array<i64: 2, 128, 128>}, {pipeline_mode = #tpu.pipeline_mode<synchronous>, transform_indices = @transform_8, window_bounds = array<i64: 2, 1, 128>}, {transform_indices = @transform_9, window_bounds = array<i64: 8, 128>}]} {
    %c0_i32 = arith.constant 0 : i32
    %0 = arith.cmpi eq, %arg1, %c0_i32 : i32
    %1 = arith.extui %0 : i1 to i32
    %c0_i32_0 = arith.constant 0 : i32
    %2 = arith.cmpi ne, %1, %c0_i32_0 : i32
    scf.if %2 {
      %c0_34 = arith.constant 0 : index
      %c0_35 = arith.constant 0 : index
      %79 = vector.load %arg2[%c0_34, %c0_35] : memref<8x128xf32, #tpu.memory_space<vmem>>, vector<8x128xf32>
      %c0_36 = arith.constant 0 : index
      %c0_37 = arith.constant 0 : index
      %80 = vector.load %arg12[%c0_36, %c0_37] : memref<8x128xf32, #tpu.memory_space<vmem>>, vector<8x128xf32>
      tpu.vector_store %arg12[%c0_36, %c0_37], %79 {strides = array<i32>} : memref<8x128xf32, #tpu.memory_space<vmem>>, vector<8x128xf32>,
      %c0_38 = arith.constant 0 : index
      %c0_39 = arith.constant 0 : index
      %81 = vector.load %arg13[%c0_38, %c0_39] : memref<8x128xf32, #tpu.memory_space<vmem>>, vector<8x128xf32>
      tpu.vector_store %arg13[%c0_38, %c0_39], %79 {strides = array<i32>} : memref<8x128xf32, #tpu.memory_space<vmem>>, vector<8x128xf32>,
    } else {
    }
    %c0 = arith.constant 0 : index
    %c0_1 = arith.constant 0 : index
    %3 = vector.load %arg12[%c0, %c0_1] : memref<8x128xf32, #tpu.memory_space<vmem>>, vector<8x128xf32>
    %c0_2 = arith.constant 0 : index
    %c0_3 = arith.constant 0 : index
    %4 = vector.load %arg13[%c0_2, %c0_3] : memref<8x128xf32, #tpu.memory_space<vmem>>, vector<8x128xf32>
    %5 = arith.index_cast %arg1 : i32 to index
    %c0_4 = arith.constant 0 : index
    %c0_5 = arith.constant 0 : index
    %6 = vector.load %arg3[%5, %c0_4, %c0_5] : memref<2x128x128xbf16, #tpu.memory_space<vmem>>, vector<1x128x128xbf16>
    %7 = vector.shape_cast %6 : vector<1x128x128xbf16> to vector<128x128xbf16>
    %8 = arith.index_cast %arg1 : i32 to index
    %c0_6 = arith.constant 0 : index
    %c0_7 = arith.constant 0 : index
    %9 = vector.load %arg4[%8, %c0_6, %c0_7] : memref<2x1x128xf32, #tpu.memory_space<vmem>>, vector<1x1x128xf32>
    %10 = vector.shape_cast %9 : vector<1x1x128xf32> to vector<1x128xf32>
    %11 = arith.index_cast %arg1 : i32 to index
    %c0_8 = arith.constant 0 : index
    %c0_9 = arith.constant 0 : index
    %12 = vector.load %arg5[%11, %c0_8, %c0_9] : memref<2x128x128xbf16, #tpu.memory_space<vmem>>, vector<1x128x128xbf16>
    %13 = vector.shape_cast %12 : vector<1x128x128xbf16> to vector<128x128xbf16>
    %14 = arith.index_cast %arg1 : i32 to index
    %c0_10 = arith.constant 0 : index
    %c0_11 = arith.constant 0 : index
    %15 = vector.load %arg6[%14, %c0_10, %c0_11] : memref<2x1x128xf32, #tpu.memory_space<vmem>>, vector<1x1x128xf32>
    %16 = vector.shape_cast %15 : vector<1x1x128xf32> to vector<1x128xf32>
    %17 = arith.index_cast %arg1 : i32 to index
    %c0_12 = arith.constant 0 : index
    %c0_13 = arith.constant 0 : index
    %18 = vector.load %arg7[%17, %c0_12, %c0_13] : memref<2x128x128xbf16, #tpu.memory_space<vmem>>, vector<1x128x128xbf16>
    %19 = vector.shape_cast %18 : vector<1x128x128xbf16> to vector<128x128xbf16>
    %20 = arith.index_cast %arg1 : i32 to index
    %c0_14 = arith.constant 0 : index
    %c0_15 = arith.constant 0 : index
    %21 = vector.load %arg8[%20, %c0_14, %c0_15] : memref<2x1x128xf32, #tpu.memory_space<vmem>>, vector<1x1x128xf32>
    %22 = vector.shape_cast %21 : vector<1x1x128xf32> to vector<1x128xf32>
    %23 = arith.index_cast %arg1 : i32 to index
    %c0_16 = arith.constant 0 : index
    %c0_17 = arith.constant 0 : index
    %24 = vector.load %arg9[%23, %c0_16, %c0_17] : memref<2x128x128xbf16, #tpu.memory_space<vmem>>, vector<1x128x128xbf16>
    %25 = vector.shape_cast %24 : vector<1x128x128xbf16> to vector<128x128xbf16>
    %26 = arith.index_cast %arg1 : i32 to index
    %c0_18 = arith.constant 0 : index
    %c0_19 = arith.constant 0 : index
    %27 = vector.load %arg10[%26, %c0_18, %c0_19] : memref<2x1x128xf32, #tpu.memory_space<vmem>>, vector<1x1x128xf32>
    %28 = vector.shape_cast %27 : vector<1x1x128xf32> to vector<1x128xf32>
    %29 = arith.truncf %4 : vector<8x128xf32> to vector<8x128xbf16>
    %cst = arith.constant dense<0.000000e+00> : vector<8x128xf32>
    %30 = tpu.matmul %29, %7, %cst {dimension_numbers = #tpu.dot_dimension_numbers<[1], [0], [0], [1], [0, 0, 1, 1], [], []>} : vector<8x128xbf16>, vector<128x128xbf16>, vector<8x128xf32> -> vector<8x128xf32>
    %31 = vector.broadcast %10 : vector<1x128xf32> to vector<8x128xf32>
    %32 = arith.addf %30, %31 : vector<8x128xf32>
    %33 = arith.mulf %32, %32 : vector<8x128xf32>
    %34 = arith.mulf %32, %33 : vector<8x128xf32>
    %cst_20 = arith.constant 4.471500e-02 : f32
    %35 = vector.broadcast %cst_20 : f32 to vector<8x128xf32>
    %36 = arith.mulf %35, %34 : vector<8x128xf32>
    %37 = arith.addf %32, %36 : vector<8x128xf32>
    %cst_21 = arith.constant 0.797884583 : f32
    %38 = vector.broadcast %cst_21 : f32 to vector<8x128xf32>
    %39 = arith.mulf %38, %37 : vector<8x128xf32>
    %40 = math.tanh %39 : vector<8x128xf32>
    %cst_22 = arith.constant 1.000000e+00 : f32
    %41 = vector.broadcast %cst_22 : f32 to vector<8x128xf32>
    %42 = arith.addf %41, %40 : vector<8x128xf32>
    %cst_23 = arith.constant 5.000000e-01 : f32
    %43 = vector.broadcast %cst_23 : f32 to vector<8x128xf32>
    %44 = arith.mulf %43, %42 : vector<8x128xf32>
    %45 = arith.mulf %32, %44 : vector<8x128xf32>
    %46 = arith.truncf %45 : vector<8x128xf32> to vector<8x128xbf16>
    %cst_24 = arith.constant dense<0.000000e+00> : vector<8x128xf32>
    %47 = tpu.matmul %46, %13, %cst_24 {dimension_numbers = #tpu.dot_dimension_numbers<[1], [0], [0], [1], [0, 0, 1, 1], [], []>} : vector<8x128xbf16>, vector<128x128xbf16>, vector<8x128xf32> -> vector<8x128xf32>
    %48 = vector.broadcast %16 : vector<1x128xf32> to vector<8x128xf32>
    %49 = arith.addf %47, %48 : vector<8x128xf32>
    %50 = arith.addf %3, %49 : vector<8x128xf32>
    %51 = arith.truncf %50 : vector<8x128xf32> to vector<8x128xbf16>
    %cst_25 = arith.constant dense<0.000000e+00> : vector<8x128xf32>
    %52 = tpu.matmul %51, %19, %cst_25 {dimension_numbers = #tpu.dot_dimension_numbers<[1], [0], [0], [1], [0, 0, 1, 1], [], []>} : vector<8x128xbf16>, vector<128x128xbf16>, vector<8x128xf32> -> vector<8x128xf32>
    %53 = vector.broadcast %22 : vector<1x128xf32> to vector<8x128xf32>
    %54 = arith.addf %52, %53 : vector<8x128xf32>
    %55 = arith.mulf %54, %54 : vector<8x128xf32>
    %56 = arith.mulf %54, %55 : vector<8x128xf32>
    %cst_26 = arith.constant 4.471500e-02 : f32
    %57 = vector.broadcast %cst_26 : f32 to vector<8x128xf32>
    %58 = arith.mulf %57, %56 : vector<8x128xf32>
    %59 = arith.addf %54, %58 : vector<8x128xf32>
    %cst_27 = arith.constant 0.797884583 : f32
    %60 = vector.broadcast %cst_27 : f32 to vector<8x128xf32>
    %61 = arith.mulf %60, %59 : vector<8x128xf32>
    %62 = math.tanh %61 : vector<8x128xf32>
    %cst_28 = arith.constant 1.000000e+00 : f32
    %63 = vector.broadcast %cst_28 : f32 to vector<8x128xf32>
    %64 = arith.addf %63, %62 : vector<8x128xf32>
    %cst_29 = arith.constant 5.000000e-01 : f32
    %65 = vector.broadcast %cst_29 : f32 to vector<8x128xf32>
    %66 = arith.mulf %65, %64 : vector<8x128xf32>
    %67 = arith.mulf %54, %66 : vector<8x128xf32>
    %68 = arith.truncf %67 : vector<8x128xf32> to vector<8x128xbf16>
    %cst_30 = arith.constant dense<0.000000e+00> : vector<8x128xf32>
    %69 = tpu.matmul %68, %25, %cst_30 {dimension_numbers = #tpu.dot_dimension_numbers<[1], [0], [0], [1], [0, 0, 1, 1], [], []>} : vector<8x128xbf16>, vector<128x128xbf16>, vector<8x128xf32> -> vector<8x128xf32>
    %70 = vector.broadcast %28 : vector<1x128xf32> to vector<8x128xf32>
    %71 = arith.addf %69, %70 : vector<8x128xf32>
    %72 = arith.addf %4, %71 : vector<8x128xf32>
    %c1_i32 = arith.constant 1 : i32
    %73 = arith.cmpi slt, %arg1, %c1_i32 : i32
    %74 = arith.extui %73 : i1 to i32
    %c0_i32_31 = arith.constant 0 : i32
    %75 = arith.cmpi ne, %74, %c0_i32_31 : i32
    scf.if %75 {
      %c0_34 = arith.constant 0 : index
      %c0_35 = arith.constant 0 : index
      %79 = vector.load %arg12[%c0_34, %c0_35] : memref<8x128xf32, #tpu.memory_space<vmem>>, vector<8x128xf32>
      tpu.vector_store %arg12[%c0_34, %c0_35], %50 {strides = array<i32>} : memref<8x128xf32, #tpu.memory_space<vmem>>, vector<8x128xf32>,
      %c0_36 = arith.constant 0 : index
      %c0_37 = arith.constant 0 : index
      %80 = vector.load %arg13[%c0_36, %c0_37] : memref<8x128xf32, #tpu.memory_space<vmem>>, vector<8x128xf32>
      tpu.vector_store %arg13[%c0_36, %c0_37], %72 {strides = array<i32>} : memref<8x128xf32, #tpu.memory_space<vmem>>, vector<8x128xf32>,
    } else {
    }
    %c1_i32_32 = arith.constant 1 : i32
    %76 = arith.cmpi eq, %arg1, %c1_i32_32 : i32
    %77 = arith.extui %76 : i1 to i32
    %c0_i32_33 = arith.constant 0 : i32
    %78 = arith.cmpi ne, %77, %c0_i32_33 : i32
    scf.if %78 {
      %79 = arith.addf %50, %72 : vector<8x128xf32>
      %cst_34 = arith.constant 5.000000e-01 : f32
      %80 = vector.broadcast %cst_34 : f32 to vector<8x128xf32>
      %81 = arith.mulf %80, %79 : vector<8x128xf32>
      %c0_35 = arith.constant 0 : index
      %c0_36 = arith.constant 0 : index
      %82 = vector.load %arg11[%c0_35, %c0_36] : memref<8x128xf32, #tpu.memory_space<vmem>>, vector<8x128xf32>
      tpu.vector_store %arg11[%c0_35, %c0_36], %81 {strides = array<i32>} : memref<8x128xf32, #tpu.memory_space<vmem>>, vector<8x128xf32>,
    } else {
    }
    return
  }
  func.func @transform_0(%arg0: i32, %arg1: i32) -> (i32, i32) {
    %c0_i32 = arith.constant 0 : i32
    %c0_i32_0 = arith.constant 0 : i32
    return %arg0, %c0_i32 : i32, i32
  }
  func.func @transform_1(%arg0: i32, %arg1: i32) -> (i32, i32, i32) {
    %c0_i32 = arith.constant 0 : i32
    %c0_i32_0 = arith.constant 0 : i32
    %c0_i32_1 = arith.constant 0 : i32
    %c0_i32_2 = arith.constant 0 : i32
    return %c0_i32, %c0_i32_0, %c0_i32_1 : i32, i32, i32
  }
  func.func @transform_2(%arg0: i32, %arg1: i32) -> (i32, i32, i32) {
    %c0_i32 = arith.constant 0 : i32
    %c0_i32_0 = arith.constant 0 : i32
    %c0_i32_1 = arith.constant 0 : i32
    %c0_i32_2 = arith.constant 0 : i32
    return %c0_i32, %c0_i32_0, %c0_i32_1 : i32, i32, i32
  }
  func.func @transform_3(%arg0: i32, %arg1: i32) -> (i32, i32, i32) {
    %c0_i32 = arith.constant 0 : i32
    %c0_i32_0 = arith.constant 0 : i32
    %c0_i32_1 = arith.constant 0 : i32
    %c0_i32_2 = arith.constant 0 : i32
    return %c0_i32, %c0_i32_0, %c0_i32_1 : i32, i32, i32
  }
  func.func @transform_4(%arg0: i32, %arg1: i32) -> (i32, i32, i32) {
    %c0_i32 = arith.constant 0 : i32
    %c0_i32_0 = arith.constant 0 : i32
    %c0_i32_1 = arith.constant 0 : i32
    %c0_i32_2 = arith.constant 0 : i32
    return %c0_i32, %c0_i32_0, %c0_i32_1 : i32, i32, i32
  }
  func.func @transform_5(%arg0: i32, %arg1: i32) -> (i32, i32, i32) {
    %c0_i32 = arith.constant 0 : i32
    %c0_i32_0 = arith.constant 0 : i32
    %c0_i32_1 = arith.constant 0 : i32
    %c0_i32_2 = arith.constant 0 : i32
    return %c0_i32, %c0_i32_0, %c0_i32_1 : i32, i32, i32
  }
  func.func @transform_6(%arg0: i32, %arg1: i32) -> (i32, i32, i32) {
    %c0_i32 = arith.constant 0 : i32
    %c0_i32_0 = arith.constant 0 : i32
    %c0_i32_1 = arith.constant 0 : i32
    %c0_i32_2 = arith.constant 0 : i32
    return %c0_i32, %c0_i32_0, %c0_i32_1 : i32, i32, i32
  }
  func.func @transform_7(%arg0: i32, %arg1: i32) -> (i32, i32, i32) {
    %c0_i32 = arith.constant 0 : i32
    %c0_i32_0 = arith.constant 0 : i32
    %c0_i32_1 = arith.constant 0 : i32
    %c0_i32_2 = arith.constant 0 : i32
    return %c0_i32, %c0_i32_0, %c0_i32_1 : i32, i32, i32
  }
  func.func @transform_8(%arg0: i32, %arg1: i32) -> (i32, i32, i32) {
    %c0_i32 = arith.constant 0 : i32
    %c0_i32_0 = arith.constant 0 : i32
    %c0_i32_1 = arith.constant 0 : i32
    %c0_i32_2 = arith.constant 0 : i32
    return %c0_i32, %c0_i32_0, %c0_i32_1 : i32, i32, i32
  }
  func.func @transform_9(%arg0: i32, %arg1: i32) -> (i32, i32) {
    %c0_i32 = arith.constant 0 : i32
    %c0_i32_0 = arith.constant 0 : i32
    return %arg0, %c0_i32 : i32, i32
  }
}

</mosaic_0001>

<bundles_post_ra>
// kernel: reversible_sequence_forward.1
= control target key start
LH: loop header
LB: loop body
LE: loop exit
PB: predicated region body
PF: predicated region fallthrough
CT: control target
= control target key end

     0   :  { %s1263_s30 = smov 0   ;;  %s1265_s10 = smov 0   ;;  %s1412_s0 = inlined_call_operand.vmem [shape: f32[16,128], index: 0, kind: input, shape index: {}]   ;;  %s1413_s1 = inlined_call_operand.vmem [shape: bf16[2,128,128], index: 1, kind: input, shape index: {}]   ;;  %s1414_s2 = inlined_call_operand.vmem [shape: f32[2,1,128], index: 2, kind: input, shape index: {}]   ;;  %s1415_s3 = inlined_call_operand.vmem [shape: bf16[2,128,128], index: 3, kind: input, shape index: {}]   ;;  %s1416_s4 = inlined_call_operand.vmem [shape: f32[2,1,128], index: 4, kind: input, shape index: {}]   ;;  %s1417_s5 = inlined_call_operand.vmem [shape: bf16[2,128,128], index: 5, kind: input, shape index: {}]   ;;  %s1418_s6 = inlined_call_operand.vmem [shape: f32[2,1,128], index: 6, kind: input, shape index: {}]   ;;  %s1419_s7 = inlined_call_operand.vmem [shape: bf16[2,128,128], index: 7, kind: input, shape index: {}]   ;;  %s1420_s8 = inlined_call_operand.vmem [shape: f32[2,1,128], index: 8, kind: input, shape index: {}]   ;;  %s1421_s9 = inlined_call_operand.vmem [shape: f32[16,128], index: 9, kind: output, shape index: {}]  }
   0x1   :  { %s1267_s11 = smov 0   ;;  %s1269_s12 = smov 0  }
   0x2   :  { %s1271_s13 = smov 0  }
   0x3 LB: > { %s28_s14 = sadd.s32 1, %s1201_s11  ;;  %s31_s15 = sadd.s32 1, %s1205_s12  ;;  %s1209_s13 = sphi %s1271_s13, %s19_s13   ;;  %s1205_s12 = sphi %s1269_s12, %s1425_s12   ;;  %s1201_s11 = sphi %s1267_s11, %s1424_s11   ;;  %s1197_s10 = sphi %s1265_s10, %s1423_s10   ;;  %s1193_s30 = sphi %s1263_s30, %s1422_s30  }
   0x4   : > { %p29_p0 = scmp.ge.s32.totalorder %s28_s14, 2  ;;  %p924_p1 = scmp.ge.s32.totalorder %s1209_s13, 1 }
   0x5   : > { %p298_p2 = scmp.lt.s32.totalorder %s1209_s13, 5 }
   0x6   : > { %s1427_s14 = smov (%p29_p0, %s28_s14), 0  ;;  %s1429_s15 = smov (!%p29_p0, %s31_s15), %s1205_s12 }
   0x7   : > { %p299_p3 = pnand %p924_p1, %p298_p2  ;;  %p33_p4 = scmp.ge.s32.totalorder %s1429_s15, 2 }
   0x8   : > { %p332_p5 = scmp.lt.s32.totalorder (!%p299_p3), %s1197_s10, 1  ;;  %p927_p6 = scmp.ne.s32.totalorder (!%p299_p3), %s1193_s30, 0 }
   0x9   : > { %s1431_s15 = smov (%p33_p4, %s1429_s15), 0  ;;  %302 = sbr.rel (%p299_p3) target bundleno = 987 (0x3db), region = 56 }
  0x10   : > { %s1433_s10 = smov (!%p332_p5, %s1197_s10), 1  ;;  %344 = sbr.rel (%p927_p6) target bundleno = 23 (0x17), region = 60 }
  0x11   : > { %s925_s16 = sshll.u32 %s1433_s10, 3 }
  0x12   : > { %s335_s19 = scalar_lea.vmem %s1412_s0, %s925_s16  ;;  %s1301_s22 = scalar_lea.vmem %s1421_s9, %s925_s16 }
  0x13   : > { %v345_v0 = vld [vmem:[%s335_s19] sm:$0xff] (!%p927_p6) }
  0x14   : > { %346 = vst [vmem:[#allocation2] sm:$0xff] (!%p927_p6), %v345_v0  ;;  %347 = vst [vmem:[#allocation3] sm:$0xff] (!%p927_p6), %v345_v0 }
  0x17 PF: > { %s1305_s23 = sshll.u32 %s1193_s30, 6  ;;  %v1211_v1 = vmov 0.0   ;;  %vm1212_vm0 = vmmov 0   ;;  %s369_s20 = scalar_lea.vmem %s1414_s2, %s1193_s30 }
  0x18   : > { %1013 = vmatprep.subr.bf16.mxu0 %v1211_v1  ;;  %s352_s26 = scalar_lea.vmem %s1413_s1, %s1305_s23  ;;  %1029 = vmatprep.mubr.msk.bf16.mxu0 %vm1212_vm0, %v1211_v1  ;;  %s372_s29 = scalar_lea.vmem %s1415_s3, %s1305_s23  ;;  %v933_v26 = vld [vmem:[%s369_s20] ss:$0 sm:$0xff] }
  0x19   : > { %v1135_v2 = vld [vmem:[%s352_s26] sm:$0xff]   ;;  %1033 = vmatprep.subr.bf16.mxu1 %v1211_v1  ;;  %1049 = vmatprep.mubr.msk.bf16.mxu1 %vm1212_vm0, %v1211_v1  ;;  %v1136_v3 = vld [vmem:[%s352_s26 + $0x8] sm:$0xff]   ;;  %v1137_v4 = vld [vmem:[%s352_s26 + $0x10] sm:$0xff]   ;;  %s1347_s17 = scalar_lea.vmem %s1417_s5, %s1305_s23  ;;  %s389_s25 = scalar_lea.vmem %s1416_s4, %s1193_s30 }
  0x1a   : > { %1014 = vmatpush3.bf16.msra.mxu0 %v1135_v2  ;;  %v1138_v5 = vld [vmem:[%s352_s26 + $0x18] sm:$0xff]   ;;  %v1139_v6 = vld [vmem:[%s352_s26 + $0x20] sm:$0xff]   ;;  %v1140_v7 = vld [vmem:[%s352_s26 + $0x28] sm:$0xff]   ;;  %s412_s28 = scalar_lea.vmem %s1419_s7, %s1305_s23  ;;  %s409_s10 = scalar_lea.vmem %s1418_s6, %s1193_s30 }
  0x1b   : > { %1015 = vmatprep.subr.bf16.mxu0 %v1211_v1  ;;  %v1141_v8 = vld [vmem:[%s352_s26 + $0x30] sm:$0xff]   ;;  %v1142_v9 = vld [vmem:[%s352_s26 + $0x38] sm:$0xff]   ;;  %v1323_v10 = vld [vmem:[#allocation3] sm:$0xff]  ;;  %s429_s18 = scalar_lea.vmem %s1420_s8, %s1193_s30  ;;  %p969_p7 = scmp.ge.s32.totalorder %s1193_s30, 1 }
  0x1c   : > { %v431_v11 = vpack.c.bf16 %v1323_v10, %v1323_v10  ;;  %v1143_v12 = vld [vmem:[%s372_s29] sm:$0xff]   ;;  %v1144_v13 = vld [vmem:[%s372_s29 + $0x8] sm:$0xff]   ;;  %v1145_v14 = vld [vmem:[%s372_s29 + $0x10] sm:$0xff]  }
  0x1d   : > { %1034 = vmatpush3.bf16.msra.mxu1 %v1143_v12  ;;  %v1146_v15 = vld [vmem:[%s372_s29 + $0x18] sm:$0xff]   ;;  %v1147_v16 = vld [vmem:[%s372_s29 + $0x20] sm:$0xff]   ;;  %v1148_v17 = vld [vmem:[%s372_s29 + $0x28] sm:$0xff]  }
  0x1e   : > { %1016 = vmatpush3.bf16.msra.mxu0 %v1136_v3  ;;  %1035 = vmatprep.subr.bf16.mxu1 %v1211_v1  ;;  %v1149_v18 = vld [vmem:[%s372_s29 + $0x30] sm:$0xff]   ;;  %v1150_v19 = vld [vmem:[%s372_s29 + $0x38] sm:$0xff]   ;;  %v1151_v20 = vld [vmem:[%s1347_s17] sm:$0xff]  }
  0x1f   : > { %1017 = vmatprep.subr.bf16.mxu0 %v1211_v1  ;;  %v1152_v21 = vld [vmem:[%s1347_s17 + $0x8] sm:$0xff]   ;;  %v1153_v22 = vld [vmem:[%s1347_s17 + $0x10] sm:$0xff]   ;;  %v1154_v23 = vld [vmem:[%s1347_s17 + $0x18] sm:$0xff]  }
  0x20   : > { %v1155_v24 = vld [vmem:[%s1347_s17 + $0x20] sm:$0xff]   ;;  %v1156_v25 = vld [vmem:[%s1347_s17 + $0x28] sm:$0xff]   ;;  %v1157_v42 = vld [vmem:[%s1347_s17 + $0x30] sm:$0xff]  }
  0x21   : > { %1036 = vmatpush3.bf16.msra.mxu1 %v1144_v13  ;;  %v1158_v43 = vld [vmem:[%s1347_s17 + $0x38] sm:$0xff]   ;;  %v942_v44 = vld [vmem:[%s389_s25] ss:$0 sm:$0xff]  ;;  %v1160_v54 = vld [vmem:[%s412_s28 + $0x8] sm:$0xff]  }
  0x22   : > { %1018 = vmatpush3.bf16.msra.mxu0 %v1137_v4  ;;  %1037 = vmatprep.subr.bf16.mxu1 %v1211_v1  ;;  %v348_v45 = vld [vmem:[#allocation2] sm:$0xff]  ;;  %v1161_v55 = vld [vmem:[%s412_s28 + $0x10] sm:$0xff]   ;;  %v1162_v56 = vld [vmem:[%s412_s28 + $0x18] sm:$0xff]  }
  0x23   : > { %1019 = vmatprep.subr.bf16.mxu0 %v1211_v1  ;;  %v1159_v53 = vld [vmem:[%s412_s28] sm:$0xff]   ;;  %v1164_v58 = vld [vmem:[%s412_s28 + $0x28] sm:$0xff]   ;;  %v1165_v59 = vld [vmem:[%s412_s28 + $0x30] sm:$0xff]  }
  0x24   : > { %v1163_v57 = vld [vmem:[%s412_s28 + $0x20] sm:$0xff]   ;;  %v1166_v60 = vld [vmem:[%s412_s28 + $0x38] sm:$0xff]  }
  0x25   : > { %1038 = vmatpush3.bf16.msra.mxu1 %v1145_v14  ;;  %v951_v61 = vld [vmem:[%s409_s10] ss:$0 sm:$0xff] }
  0x26   : > { %1020 = vmatpush3.bf16.msra.mxu0 %v1138_v5  ;;  %1039 = vmatprep.subr.bf16.mxu1 %v1211_v1  ;;  %v960_v14 = vld [vmem:[%s429_s18] ss:$0 sm:$0xff] }
  0x27   : > { %1021 = vmatprep.subr.bf16.mxu0 %v1211_v1 }
  0x29   : > { %1040 = vmatpush3.bf16.msra.mxu1 %v1146_v15 }
  0x2a   : > { %1022 = vmatpush3.bf16.msra.mxu0 %v1139_v6  ;;  %1041 = vmatprep.subr.bf16.mxu1 %v1211_v1 }
  0x2b   : > { %1023 = vmatprep.subr.bf16.mxu0 %v1211_v1 }
  0x2d   : > { %1042 = vmatpush3.bf16.msra.mxu1 %v1147_v16 }
  0x2e   : > { %1024 = vmatpush3.bf16.msra.mxu0 %v1140_v7  ;;  %1043 = vmatprep.subr.bf16.mxu1 %v1211_v1 }
  0x2f   : > { %1025 = vmatprep.subr.bf16.mxu0 %v1211_v1 }
  0x31   : > { %1044 = vmatpush3.bf16.msra.mxu1 %v1148_v17 }
  0x32   : > { %1026 = vmatpush3.bf16.msra.mxu0 %v1141_v8  ;;  %1045 = vmatprep.subr.bf16.mxu1 %v1211_v1 }
  0x33   : > { %1027 = vmatprep.subr.bf16.mxu0 %v1211_v1 }
  0x35   : > { %1046 = vmatpush3.bf16.msra.mxu1 %v1149_v18 }
  0x36   : > { %1028 = vmatpush3.bf16.msra.mxu0 %v1142_v9  ;;  %1047 = vmatprep.subr.bf16.mxu1 %v1211_v1 }
  0x37   : > { %1053 = vmatprep.subr.bf16.mxu0 %v1211_v1 }
  0x39   : > { %1030 = vmatmul.mubr.bf16.vlgmr.msra.gmra.mrb[0].mxu0 %v431_v11  ;;  %1048 = vmatpush3.bf16.msra.mxu1 %v1150_v19 }
  0x3a   : > { %1069 = vmatprep.mubr.msk.bf16.mxu0 %vm1212_vm0, %v1211_v1  ;;  %1073 = vmatprep.subr.bf16.mxu1 %v1211_v1 }
  0x3b   : > { %1054 = vmatpush3.bf16.msra.mxu0 %v1151_v20 }
  0x3c   : > { %1055 = vmatprep.subr.bf16.mxu0 %v1211_v1 }
  0x3f   : > { %1056 = vmatpush3.bf16.msra.mxu0 %v1152_v21 }
  0x40   : > { %1057 = vmatprep.subr.bf16.mxu0 %v1211_v1 }
  0x43   : > { %1058 = vmatpush3.bf16.msra.mxu0 %v1153_v22 }
  0x44   : > { %1059 = vmatprep.subr.bf16.mxu0 %v1211_v1 }
  0x47   : > { %1060 = vmatpush3.bf16.msra.mxu0 %v1154_v23 }
  0x48   : > { %1061 = vmatprep.subr.bf16.mxu0 %v1211_v1 }
  0x4b   : > { %1062 = vmatpush3.bf16.msra.mxu0 %v1155_v24 }
  0x4c   : > { %1063 = vmatprep.subr.bf16.mxu0 %v1211_v1 }
  0x4f   : > { %1064 = vmatpush3.bf16.msra.mxu0 %v1156_v25 }
  0x50   : > { %1065 = vmatprep.subr.bf16.mxu0 %v1211_v1 }
  0x53   : > { %1066 = vmatpush3.bf16.msra.mxu0 %v1157_v42 }
  0x54   : > { %1067 = vmatprep.subr.bf16.mxu0 %v1211_v1 }
  0x57   : > { %1068 = vmatpush3.bf16.msra.mxu0 %v1158_v43 }
 0x10c   : > { %v520_v27 = vpop.f32.mrb[0].mxu0 }
 0x10d   : > { %v521_v28 = vadd.f32 %v933_v26, %v520_v27  ;;  %v1031_v29 = vpop.f32.mrb[1].mxu0 }
 0x10e   : > { %v523_v30 = vpop.f32.mrb[2].mxu0 }
 0x10f   : > { %v526_v31 = vmul.f32 %v521_v28, %v521_v28  ;;  %v1032_v32 = vpop.f32.mrb[3].mxu0 }
 0x111   : > { %v527_v33 = vmul.f32 %v526_v31, %v521_v28 }
 0x113   : > { %v528_v34 = vmul.f32 0.044715, %v527_v33 }
 0x115   : > { %v529_v35 = vadd.f32 %v528_v34, %v521_v28 }
 0x117   : > { %v530_v36 = vmul.f32 0.7978846, %v529_v35 }
 0x119   : > { %1167 = vtanh.f32 %v530_v36 }
 0x123   : > { %v1168_v37 = vpop.eup %1167 }
 0x124   : > { %v532_v38 = vadd.f32 1.0, %v1168_v37 }
 0x126   : > { %v533_v39 = vmul.f32 0.5, %v532_v38 }
 0x128   : > { %v534_v40 = vmul.f32 %v533_v39, %v521_v28 }
 0x12a   : > { %v535_v41 = vpack.c.bf16 %v534_v40, %v534_v40 }
 0x12c   : > { %1050 = vmatmul.mubr.bf16.vlgmr.msra.gmra.mrb[0].mxu1 %v535_v41 }
 0x12d   : > { %1089 = vmatprep.mubr.msk.bf16.mxu1 %vm1212_vm0, %v1211_v1  ;;  %1074 = vmatpush3.bf16.msra.mxu1 %v1159_v53 }
 0x12e   : > { %1075 = vmatprep.subr.bf16.mxu1 %v1211_v1 }
 0x131   : > { %1076 = vmatpush3.bf16.msra.mxu1 %v1160_v54 }
 0x132   : > { %1077 = vmatprep.subr.bf16.mxu1 %v1211_v1 }
 0x135   : > { %1078 = vmatpush3.bf16.msra.mxu1 %v1161_v55 }
 0x136   : > { %1079 = vmatprep.subr.bf16.mxu1 %v1211_v1 }
 0x139   : > { %1080 = vmatpush3.bf16.msra.mxu1 %v1162_v56 }
 0x13a   : > { %1081 = vmatprep.subr.bf16.mxu1 %v1211_v1 }
 0x13d   : > { %1082 = vmatpush3.bf16.msra.mxu1 %v1163_v57 }
 0x13e   : > { %1083 = vmatprep.subr.bf16.mxu1 %v1211_v1 }
 0x141   : > { %1084 = vmatpush3.bf16.msra.mxu1 %v1164_v58 }
 0x142   : > { %1085 = vmatprep.subr.bf16.mxu1 %v1211_v1 }
 0x145   : > { %1086 = vmatpush3.bf16.msra.mxu1 %v1165_v59 }
 0x146   : > { %1087 = vmatprep.subr.bf16.mxu1 %v1211_v1 }
 0x149   : > { %1088 = vmatpush3.bf16.msra.mxu1 %v1166_v60 }
 0x1ff   : > { %v624_v46 = vpop.f32.mrb[0].mxu1 }
 0x200   : > { %v625_v47 = vadd.f32 %v942_v44, %v624_v46  ;;  %v1051_v48 = vpop.f32.mrb[1].mxu1 }
 0x201   : > { %v627_v49 = vpop.f32.mrb[2].mxu1 }
 0x202   : > { %v630_v50 = vadd.f32 %v625_v47, %v348_v45  ;;  %v1052_v51 = vpop.f32.mrb[3].mxu1 }
 0x204   : > { %v631_v52 = vpack.c.bf16 %v630_v50, %v630_v50  ;;  %835 = vst [vmem:[#allocation2] sm:$0xff] (!%p969_p7), %v630_v50 }
 0x206   : > { %1070 = vmatmul.mubr.bf16.vlgmr.msra.gmra.mrb[4].mxu0 %v631_v52 }
 0x2d9   : > { %v720_v62 = vpop.f32.mrb[4].mxu0 }
 0x2da   : > { %v721_v63 = vadd.f32 %v951_v61, %v720_v62  ;;  %v1071_v0 = vpop.f32.mrb[5].mxu0 }
 0x2db   : > { %v723_v2 = vpop.f32.mrb[6].mxu0 }
 0x2dc   : > { %v726_v3 = vmul.f32 %v721_v63, %v721_v63  ;;  %v1072_v4 = vpop.f32.mrb[7].mxu0 }
 0x2de   : > { %v727_v5 = vmul.f32 %v726_v3, %v721_v63 }
 0x2e0   : > { %v728_v6 = vmul.f32 0.044715, %v727_v5 }
 0x2e2   : > { %v729_v7 = vadd.f32 %v728_v6, %v721_v63 }
 0x2e4   : > { %v730_v8 = vmul.f32 0.7978846, %v729_v7 }
 0x2e6   : > { %1169 = vtanh.f32 %v730_v8 }
 0x2f0   : > { %v1170_v9 = vpop.eup %1169 }
 0x2f1   : > { %v732_v1 = vadd.f32 1.0, %v1170_v9 }
 0x2f3   : > { %v733_v11 = vmul.f32 0.5, %v732_v1 }
 0x2f5   : > { %v734_v12 = vmul.f32 %v733_v11, %v721_v63 }
 0x2f7   : > { %v735_v13 = vpack.c.bf16 %v734_v12, %v734_v12 }
 0x2f9   : > { %1090 = vmatmul.mubr.bf16.vlgmr.msra.gmra.mrb[4].mxu1 %v735_v13 }
 0x3c9   : > { %834 = sbr.rel (%p969_p7) target bundleno = 978 (0x3d2), region = 64 }
 0x3cc   : > { %v824_v15 = vpop.f32.mrb[4].mxu1 }
 0x3cd   : > { %v825_v16 = vadd.f32 %v960_v14, %v824_v15  ;;  %v1091_v17 = vpop.f32.mrb[5].mxu1 }
 0x3ce   : > { %v827_v18 = vpop.f32.mrb[6].mxu1 }
 0x3cf   : > { %v830_v19 = vadd.f32 %v825_v16, %v1323_v10  ;;  %v1092_v20 = vpop.f32.mrb[7].mxu1 }
 0x3d1   : > { %836 = vst [vmem:[#allocation3] sm:$0xff] %v830_v19 }
 0x3d2 PF: > { %p970_p8 = scmp.ne.s32.totalorder %s1193_s30, 1 }
 0x3d3   : > { %v841_v21 = vadd.f32 (!%p970_p8), %v830_v19, %v630_v50 }
 0x3d4   : > { %840 = sbr.rel (%p970_p8) target bundleno = 987 (0x3db), region = 68 }
 0x3d5   : > { %v842_v22 = vmul.f32 (!%p970_p8), 0.5, %v841_v21 }
 0x3d7   : > { %843 = vst [vmem:[%s1301_s22] sm:$0xff] (!%p970_p8), %v842_v22 }
 0x3db PF: > { %s19_s13 = sadd.s32 1, %s1209_s13   ;;  %s1422_s30 = smov %s1201_s11 }
 0x3dc   : > { %p16_p9 = scmp.ge.s32.totalorder %s19_s13, 6   ;;  %s1423_s10 = smov %s1205_s12 }
 0x3dd   : > { %s1424_s11 = smov %s1427_s14  ;;  %s1425_s12 = smov %s1431_s15 }
 0x3de   :  { %18 = sbr.rel (!%p16_p9) target bundleno = 3 (0x3), region = 106 }

</bundles_post_ra>
